<compile_context>
chip_gen: v7x
topology: tpu7x:2x2x1
jax: 0.10.0
libtpu: 0.0.40
codegen_flags: <defaults>
</compile_context>

<pallas_src>
import functools

import jax
import jax.numpy as jnp
from jax.experimental import pallas as pl
from jax.experimental.pallas import tpu as pltpu


def _round_up(x, m):
    return (x + m - 1) // m * m


def _ffn_kernel(x_ref, w1_ref, b1_ref, w2_ref, b2_ref, o_ref, acc_ref):
    # x_ref:   (tm, d_model_p)      native dtype (bf16 or f32) -> MXU operand
    # w1_ref:  (d_model_p, tk)      native dtype
    # b1_ref:  (1, tk)
    # w2_ref:  (tk, d_model_p)      native dtype
    # b2_ref:  (1, d_model_p)
    # o_ref:   (tm, d_model_p)
    # acc_ref: (tm, d_model_p) f32 accumulator, resident across the middle (k) axis.
    k = pl.program_id(1)

    @pl.when(k == 0)
    def _():
        acc_ref[...] = jnp.zeros_like(acc_ref)

    # l_feed: x @ W1 + b1 — operands stay in their native dtype, f32 accumulation on MXU.
    h = jnp.dot(x_ref[...], w1_ref[...], preferred_element_type=jnp.float32)
    h = h + b1_ref[...].astype(jnp.float32)

    # NewGELU (f32): 0.5*h*(1 + tanh(sqrt(2/pi) * h * (1 + 0.044715*h^2)))
    c = jnp.float32(0.7978845608028654)  # sqrt(2/pi)
    g = 0.5 * h * (1.0 + jnp.tanh(c * h * (1.0 + jnp.float32(0.044715) * (h * h))))

    # l_proj partial product for this middle tile; accumulate in f32.
    acc_ref[...] += jnp.dot(g.astype(w2_ref.dtype), w2_ref[...],
                            preferred_element_type=jnp.float32)

    @pl.when(k == pl.num_programs(1) - 1)
    def _():
        # TODO(synk): dropout is identity in eval mode; training mode would need
        # pltpu.prng_seed / pltpu.prng_random_bits here.
        o_ref[...] = (acc_ref[...] + b2_ref[...].astype(jnp.float32)).astype(o_ref.dtype)


def _pick_middle_tile(d_middle, tk_request):
    """Pick a k-tile: multiple of 128, <= tk_request, dividing round_up(d_middle, 128)."""
    d_mid_p = _round_up(d_middle, 128)
    n_lanes = d_mid_p // 128
    max_c = max(1, tk_request // 128)
    c = 1
    for cand in range(min(max_c, n_lanes), 0, -1):
        if n_lanes % cand == 0:
            c = cand
            break
    return d_mid_p, c * 128


@functools.partial(jax.jit, static_argnames=("tm", "tk"))
def feed_forward(x, w1, b1, w2, b2, *, tm=256, tk=512):
    """x: (..., d_model). Weights pre-transposed: w1 (d_model, d_middle), w2 (d_middle, d_model),
    b1 (1, d_middle), b2 (1, d_model)."""
    orig_shape = x.shape
    d_model = orig_shape[-1]
    d_middle = w1.shape[1]
    x2 = x.reshape(-1, d_model)
    m = x2.shape[0]

    # Tile sizing. Row packing: 8 sublanes for f32, 16 for bf16.
    pack = 16 if x.dtype == jnp.bfloat16 else 8
    d_model_p = _round_up(d_model, 128)               # lane-dense output (unmasked vst)
    tm_eff = min(tm, _round_up(m, pack))              # big row tile, clamped for tiny inputs
    m_p = _round_up(m, tm_eff)
    d_middle_p, tk_eff = _pick_middle_tile(d_middle, tk)  # minimal-padding middle tile

    # Zero padding is mathematically neutral: padded weight rows/cols are zero, padded
    # bias entries are zero, and GELU(0) == 0, so padded middle columns contribute nothing.
    def pad2(a, r, c_):
        pr, pc = r - a.shape[0], c_ - a.shape[1]
        return a if (pr == 0 and pc == 0) else jnp.pad(a, ((0, pr), (0, pc)))

    x2p = pad2(x2, m_p, d_model_p)
    w1p = pad2(w1, d_model_p, d_middle_p)
    b1p = pad2(b1, 1, d_middle_p)
    w2p = pad2(w2, d_middle_p, d_model_p)
    b2p = pad2(b2, 1, d_model_p)

    grid = (m_p // tm_eff, d_middle_p // tk_eff)

    out = pl.pallas_call(
        _ffn_kernel,
        out_shape=jax.ShapeDtypeStruct((m_p, d_model_p), x.dtype),
        grid_spec=pltpu.PrefetchScalarGridSpec(
            num_scalar_prefetch=0,
            grid=grid,
            in_specs=[
                pl.BlockSpec((tm_eff, d_model_p), lambda i, k: (i, 0)),   # x rows
                pl.BlockSpec((d_model_p, tk_eff), lambda i, k: (0, k)),   # W1 middle tile
                pl.BlockSpec((1, tk_eff),         lambda i, k: (0, k)),   # b1 middle tile
                pl.BlockSpec((tk_eff, d_model_p), lambda i, k: (k, 0)),   # W2 middle tile
                pl.BlockSpec((1, d_model_p),      lambda i, k: (0, 0)),   # b2
            ],
            out_specs=pl.BlockSpec((tm_eff, d_model_p), lambda i, k: (i, 0)),
            scratch_shapes=[pltpu.VMEM((tm_eff, d_model_p), jnp.float32)],
        ),
        compiler_params=pltpu.CompilerParams(
            dimension_semantics=("parallel", "arbitrary")),
    )(x2p, w1p, b1p, w2p, b2p)

    return out[:m, :d_model].reshape(orig_shape)


def _reference(x, w1, b1, w2, b2):
    xf = x.astype(jnp.float32)
    h = xf @ w1.astype(jnp.float32) + b1.astype(jnp.float32)
    c = jnp.sqrt(2.0 / jnp.pi).astype(jnp.float32)
    g = 0.5 * h * (1.0 + jnp.tanh(c * (h + 0.044715 * h ** 3)))
    y = g @ w2.astype(jnp.float32) + b2.astype(jnp.float32)
    return y


if __name__ == "__main__":
    key = jax.random.PRNGKey(0)

    # --- f32 test, deliberately unaligned shapes (exercises the padding path) ---
    batch, seq, d_model, d_middle = 2, 8, 32, 96
    k_x, k_w1, k_b1, k_w2, k_b2 = jax.random.split(key, 5)
    x = jax.random.normal(k_x, (batch, seq, d_model), dtype=jnp.float32)
    # nn.Linear weights are (out, in); kept pre-transposed as (in, out).
    w1 = jax.random.normal(k_w1, (d_model, d_middle), dtype=jnp.float32) * 0.05
    b1 = jax.random.normal(k_b1, (1, d_middle), dtype=jnp.float32) * 0.05
    w2 = jax.random.normal(k_w2, (d_middle, d_model), dtype=jnp.float32) * 0.05
    b2 = jax.random.normal(k_b2, (1, d_model), dtype=jnp.float32) * 0.05

    out = feed_forward(x, w1, b1, w2, b2)
    jax.block_until_ready(out)
    ref = _reference(x.reshape(-1, d_model), w1, b1, w2, b2).reshape(x.shape)
    assert out.shape == x.shape
    assert jnp.allclose(out, ref.astype(x.dtype), atol=1e-4, rtol=1e-4), "f32 mismatch vs reference"

    # --- bf16 test, lane-aligned shapes (exercises bf16 MXU path with f32 accumulation) ---
    batch2, seq2, dm2, dmid2 = 2, 16, 128, 512
    kb = jax.random.split(jax.random.PRNGKey(0), 5)
    xb = jax.random.normal(kb[0], (batch2, seq2, dm2), dtype=jnp.float32).astype(jnp.bfloat16)
    w1b = (jax.random.normal(kb[1], (dm2, dmid2), dtype=jnp.float32) * 0.05).astype(jnp.bfloat16)
    b1b = (jax.random.normal(kb[2], (1, dmid2), dtype=jnp.float32) * 0.05).astype(jnp.bfloat16)
    w2b = (jax.random.normal(kb[3], (dmid2, dm2), dtype=jnp.float32) * 0.05).astype(jnp.bfloat16)
    b2b = (jax.random.normal(kb[4], (1, dm2), dtype=jnp.float32) * 0.05).astype(jnp.bfloat16)

    outb = feed_forward(xb, w1b, b1b, w2b, b2b)
    jax.block_until_ready(outb)
    refb = _reference(xb.reshape(-1, dm2), w1b, b1b, w2b, b2b).reshape(xb.shape)
    assert outb.shape == xb.shape
    assert jnp.allclose(outb.astype(jnp.float32), refb, atol=5e-2, rtol=5e-2), "bf16 mismatch vs reference"

    # --- f32 test exercising the multi-k-tile path with minimal padding (d_middle = 5*128) ---
    batch3, seq3, dm3, dmid3 = 2, 8, 64, 640
    kc = jax.random.split(jax.random.PRNGKey(1), 5)
    xc = jax.random.normal(kc[0], (batch3, seq3, dm3), dtype=jnp.float32)
    w1c = jax.random.normal(kc[1], (dm3, dmid3), dtype=jnp.float32) * 0.05
    b1c = jax.random.normal(kc[2], (1, dmid3), dtype=jnp.float32) * 0.05
    w2c = jax.random.normal(kc[3], (dmid3, dm3), dtype=jnp.float32) * 0.05
    b2c = jax.random.normal(kc[4], (1, dm3), dtype=jnp.float32) * 0.05

    outc = feed_forward(xc, w1c, b1c, w2c, b2c, tk=256)   # -> tk_eff=128, 5 k-steps, no padding
    jax.block_until_ready(outc)
    refc = _reference(xc.reshape(-1, dm3), w1c, b1c, w2c, b2c).reshape(xc.shape)
    assert outc.shape == xc.shape
    assert jnp.allclose(outc, refc, atol=5e-3, rtol=5e-3), "f32 multi-tile mismatch vs reference"

    print("KERNEL_OK")
</pallas_src>

<mosaic_0001>
module attributes {stable_mosaic.version = 11 : i64} {
  func.func @_ffn_kernel(%arg0: i32, %arg1: i32, %arg2: memref<16x128xf32, #tpu.memory_space<vmem>>, %arg3: memref<128x128xf32, #tpu.memory_space<vmem>>, %arg4: memref<1x128xf32, #tpu.memory_space<vmem>>, %arg5: memref<128x128xf32, #tpu.memory_space<vmem>>, %arg6: memref<1x128xf32, #tpu.memory_space<vmem>>, %arg7: memref<16x128xf32, #tpu.memory_space<vmem>>, %arg8: memref<16x128xf32, #tpu.memory_space<vmem>>) attributes {dimension_semantics = [#tpu.dimension_semantics<parallel>, #tpu.dimension_semantics<arbitrary>], iteration_bounds = array<i64: 1, 1>, scalar_prefetch = 0 : i64, scratch_operands = 1 : i64, tpu.core_type = #tpu.core_type<tc>, window_params = [{transform_indices = @transform_0, window_bounds = array<i64: 16, 128>}, {transform_indices = @transform_1, window_bounds = array<i64: 128, 128>}, {transform_indices = @transform_2, window_bounds = array<i64: 1, 128>}, {transform_indices = @transform_3, window_bounds = array<i64: 128, 128>}, {pipeline_mode = #tpu.pipeline_mode<synchronous>, transform_indices = @transform_4, window_bounds = array<i64: 1, 128>}, {transform_indices = @transform_5, window_bounds = array<i64: 16, 128>}]} {
    %c0_i32 = arith.constant 0 : i32
    %0 = arith.cmpi eq, %arg1, %c0_i32 : i32
    %1 = arith.extui %0 : i1 to i32
    %c0_i32_0 = arith.constant 0 : i32
    %2 = arith.cmpi ne, %1, %c0_i32_0 : i32
    scf.if %2 {
      %cst_20 = arith.constant 0.000000e+00 : f32
      %31 = vector.broadcast %cst_20 : f32 to vector<16x128xf32>
      %c0_21 = arith.constant 0 : index
      %c0_22 = arith.constant 0 : index
      %32 = vector.load %arg8[%c0_21, %c0_22] : memref<16x128xf32, #tpu.memory_space<vmem>>, vector<16x128xf32>
      tpu.vector_store %arg8[%c0_21, %c0_22], %31 {strides = array<i32>} : memref<16x128xf32, #tpu.memory_space<vmem>>, vector<16x128xf32>,
    } else {
    }
    %c0 = arith.constant 0 : index
    %c0_1 = arith.constant 0 : index
    %3 = vector.load %arg2[%c0, %c0_1] : memref<16x128xf32, #tpu.memory_space<vmem>>, vector<16x128xf32>
    %c0_2 = arith.constant 0 : index
    %c0_3 = arith.constant 0 : index
    %4 = vector.load %arg3[%c0_2, %c0_3] : memref<128x128xf32, #tpu.memory_space<vmem>>, vector<128x128xf32>
    %cst = arith.constant dense<0.000000e+00> : vector<16x128xf32>
    %5 = tpu.matmul %3, %4, %cst {dimension_numbers = #tpu.dot_dimension_numbers<[1], [0], [0], [1], [0, 0, 1, 1], [], []>} : vector<16x128xf32>, vector<128x128xf32>, vector<16x128xf32> -> vector<16x128xf32>
    %c0_4 = arith.constant 0 : index
    %c0_5 = arith.constant 0 : index
    %6 = vector.load %arg4[%c0_4, %c0_5] : memref<1x128xf32, #tpu.memory_space<vmem>>, vector<1x128xf32>
    %7 = vector.broadcast %6 : vector<1x128xf32> to vector<16x128xf32>
    %8 = arith.addf %5, %7 : vector<16x128xf32>
    %cst_6 = arith.constant 5.000000e-01 : f32
    %9 = vector.broadcast %cst_6 : f32 to vector<16x128xf32>
    %10 = arith.mulf %9, %8 : vector<16x128xf32>
    %cst_7 = arith.constant 0.797884583 : f32
    %11 = vector.broadcast %cst_7 : f32 to vector<16x128xf32>
    %12 = arith.mulf %11, %8 : vector<16x128xf32>
    %13 = arith.mulf %8, %8 : vector<16x128xf32>
    %cst_8 = arith.constant 4.471500e-02 : f32
    %14 = vector.broadcast %cst_8 : f32 to vector<16x128xf32>
    %15 = arith.mulf %14, %13 : vector<16x128xf32>
    %cst_9 = arith.constant 1.000000e+00 : f32
    %16 = vector.broadcast %cst_9 : f32 to vector<16x128xf32>
    %17 = arith.addf %16, %15 : vector<16x128xf32>
    %18 = arith.mulf %12, %17 : vector<16x128xf32>
    %19 = math.tanh %18 : vector<16x128xf32>
    %cst_10 = arith.constant 1.000000e+00 : f32
    %20 = vector.broadcast %cst_10 : f32 to vector<16x128xf32>
    %21 = arith.addf %20, %19 : vector<16x128xf32>
    %22 = arith.mulf %10, %21 : vector<16x128xf32>
    %c0_11 = arith.constant 0 : index
    %c0_12 = arith.constant 0 : index
    %23 = vector.load %arg8[%c0_11, %c0_12] : memref<16x128xf32, #tpu.memory_space<vmem>>, vector<16x128xf32>
    %c0_13 = arith.constant 0 : index
    %c0_14 = arith.constant 0 : index
    %24 = vector.load %arg5[%c0_13, %c0_14] : memref<128x128xf32, #tpu.memory_space<vmem>>, vector<128x128xf32>
    %cst_15 = arith.constant dense<0.000000e+00> : vector<16x128xf32>
    %25 = tpu.matmul %22, %24, %cst_15 {dimension_numbers = #tpu.dot_dimension_numbers<[1], [0], [0], [1], [0, 0, 1, 1], [], []>} : vector<16x128xf32>, vector<128x128xf32>, vector<16x128xf32> -> vector<16x128xf32>
    %26 = arith.addf %23, %25 : vector<16x128xf32>
    %c0_16 = arith.constant 0 : index
    %c0_17 = arith.constant 0 : index
    %27 = vector.load %arg8[%c0_16, %c0_17] : memref<16x128xf32, #tpu.memory_space<vmem>>, vector<16x128xf32>
    tpu.vector_store %arg8[%c0_16, %c0_17], %26 {strides = array<i32>} : memref<16x128xf32, #tpu.memory_space<vmem>>, vector<16x128xf32>,
    %c0_i32_18 = arith.constant 0 : i32
    %28 = arith.cmpi eq, %arg1, %c0_i32_18 : i32
    %29 = arith.extui %28 : i1 to i32
    %c0_i32_19 = arith.constant 0 : i32
    %30 = arith.cmpi ne, %29, %c0_i32_19 : i32
    scf.if %30 {
      %c0_20 = arith.constant 0 : index
      %c0_21 = arith.constant 0 : index
      %31 = vector.load %arg8[%c0_20, %c0_21] : memref<16x128xf32, #tpu.memory_space<vmem>>, vector<16x128xf32>
      %c0_22 = arith.constant 0 : index
      %c0_23 = arith.constant 0 : index
      %32 = vector.load %arg6[%c0_22, %c0_23] : memref<1x128xf32, #tpu.memory_space<vmem>>, vector<1x128xf32>
      %33 = vector.broadcast %32 : vector<1x128xf32> to vector<16x128xf32>
      %34 = arith.addf %31, %33 : vector<16x128xf32>
      %c0_24 = arith.constant 0 : index
      %c0_25 = arith.constant 0 : index
      %35 = vector.load %arg7[%c0_24, %c0_25] : memref<16x128xf32, #tpu.memory_space<vmem>>, vector<16x128xf32>
      tpu.vector_store %arg7[%c0_24, %c0_25], %34 {strides = array<i32>} : memref<16x128xf32, #tpu.memory_space<vmem>>, vector<16x128xf32>,
    } else {
    }
    return
  }
  func.func @transform_0(%arg0: i32, %arg1: i32) -> (i32, i32) {
    %c0_i32 = arith.constant 0 : i32
    %c0_i32_0 = arith.constant 0 : i32
    return %arg0, %c0_i32 : i32, i32
  }
  func.func @transform_1(%arg0: i32, %arg1: i32) -> (i32, i32) {
    %c0_i32 = arith.constant 0 : i32
    %c0_i32_0 = arith.constant 0 : i32
    return %c0_i32, %arg1 : i32, i32
  }
  func.func @transform_2(%arg0: i32, %arg1: i32) -> (i32, i32) {
    %c0_i32 = arith.constant 0 : i32
    %c0_i32_0 = arith.constant 0 : i32
    return %c0_i32, %arg1 : i32, i32
  }
  func.func @transform_3(%arg0: i32, %arg1: i32) -> (i32, i32) {
    %c0_i32 = arith.constant 0 : i32
    %c0_i32_0 = arith.constant 0 : i32
    return %arg1, %c0_i32 : i32, i32
  }
  func.func @transform_4(%arg0: i32, %arg1: i32) -> (i32, i32) {
    %c0_i32 = arith.constant 0 : i32
    %c0_i32_0 = arith.constant 0 : i32
    %c0_i32_1 = arith.constant 0 : i32
    return %c0_i32, %c0_i32_0 : i32, i32
  }
  func.func @transform_5(%arg0: i32, %arg1: i32) -> (i32, i32) {
    %c0_i32 = arith.constant 0 : i32
    %c0_i32_0 = arith.constant 0 : i32
    return %arg0, %c0_i32 : i32, i32
  }
}

</mosaic_0001>

<bundles_post_ra>
// kernel: feed_forward.1
= control target key start
LH: loop header
LB: loop body
LE: loop exit
PB: predicated region body
PF: predicated region fallthrough
CT: control target
= control target key end

     0   :  { %s581_s1 = inlined_call_operand.vmem [shape: f32[128,128], index: 1, kind: input, shape index: {}]   ;;  %s582_s0 = inlined_call_operand.vmem [shape: f32[16,128], index: 0, kind: input, shape index: {}]   ;;  %s583_s3 = inlined_call_operand.vmem [shape: f32[128,128], index: 3, kind: input, shape index: {}]   ;;  %s584_s2 = inlined_call_operand.vmem [shape: f32[1,128], index: 2, kind: input, shape index: {}]   ;;  %s585_s4 = inlined_call_operand.vmem [shape: f32[1,128], index: 4, kind: input, shape index: {}]   ;;  %s586_s5 = inlined_call_operand.vmem [shape: f32[16,128], index: 5, kind: output, shape index: {}]  }
   0x1   :  { %v28_v0 = vld [vmem:[%s581_s1] sm:$0xff]  ;;  %v29_v1 = vld [vmem:[%s581_s1 + $0x8] sm:$0xff]  ;;  %v30_v2 = vld [vmem:[%s581_s1 + $0x10] sm:$0xff] }
   0x2   :  { %v369_v3 = vpack.c.bf16 %v29_v1, %v28_v0  ;;  %v31_v4 = vld [vmem:[%s581_s1 + $0x18] sm:$0xff]  ;;  %v32_v6 = vld [vmem:[%s581_s1 + $0x20] sm:$0xff]  ;;  %v33_v7 = vld [vmem:[%s581_s1 + $0x28] sm:$0xff] }
   0x3   :  { %v373_v5 = vpack.c.bf16 %v31_v4, %v30_v2  ;;  %v377_v8 = vpack.c.bf16 %v33_v7, %v32_v6  ;;  %v34_v9 = vld [vmem:[%s581_s1 + $0x30] sm:$0xff]  ;;  %v26_v10 = vld [vmem:[%s582_s0] sm:$0xff]  ;;  %v35_v11 = vld [vmem:[%s581_s1 + $0x38] sm:$0xff] }
   0x4   :  { %370 = vmatprep.subr.bf16.mxu0 %v369_v3  ;;  %331 = vmatprep.mubr.f32.mxu0 %v26_v10  ;;  %v146_v12 = vld [vmem:[%s583_s3] sm:$0xff]  ;;  %v147_v13 = vld [vmem:[%s583_s3 + $0x8] sm:$0xff]  ;;  %v381_v15 = vpack.c.bf16 %v35_v11, %v34_v9  ;;  %v38_v19 = vld [vmem:[%s581_s1 + $0x50] sm:$0xff] }
   0x5   :  { %372 = vmatpush3.bf16.msra.mxu0 %v369_v3  ;;  %v401_v14 = vpack.c.bf16 %v147_v13, %v146_v12  ;;  %v36_v16 = vld [vmem:[%s581_s1 + $0x40] sm:$0xff]  ;;  %v37_v17 = vld [vmem:[%s581_s1 + $0x48] sm:$0xff]  ;;  %v39_v20 = vld [vmem:[%s581_s1 + $0x58] sm:$0xff] }
   0x6   :  { %374 = vmatprep.subr.bf16.mxu0 %v373_v5  ;;  %v385_v18 = vpack.c.bf16 %v37_v17, %v36_v16  ;;  %v389_v21 = vpack.c.bf16 %v39_v20, %v38_v19  ;;  %v40_v22 = vld [vmem:[%s581_s1 + $0x60] sm:$0xff]  ;;  %v41_v23 = vld [vmem:[%s581_s1 + $0x68] sm:$0xff]  ;;  %v42_v25 = vld [vmem:[%s581_s1 + $0x70] sm:$0xff] }
   0x7   :  { %402 = vmatprep.subr.bf16.mxu1 %v401_v14  ;;  %v393_v24 = vpack.c.bf16 %v41_v23, %v40_v22  ;;  %v43_v26 = vld [vmem:[%s581_s1 + $0x78] sm:$0xff]  ;;  %v27_v28 = vld [vmem:[%s582_s0 + $0x8] sm:$0xff]  ;;  %v148_v29 = vld [vmem:[%s583_s3 + $0x10] sm:$0xff] }
   0x8   :  { %404 = vmatpush3.bf16.msra.mxu1 %v401_v14  ;;  %v397_v27 = vpack.c.bf16 %v43_v26, %v42_v25  ;;  %v149_v30 = vld [vmem:[%s583_s3 + $0x18] sm:$0xff]  ;;  %v150_v32 = vld [vmem:[%s583_s3 + $0x20] sm:$0xff]  ;;  %v151_v33 = vld [vmem:[%s583_s3 + $0x28] sm:$0xff] }
   0x9   :  { %376 = vmatpush3.bf16.msra.mxu0 %v373_v5  ;;  %v405_v31 = vpack.c.bf16 %v149_v30, %v148_v29  ;;  %v409_v34 = vpack.c.bf16 %v151_v33, %v150_v32  ;;  %v152_v35 = vld [vmem:[%s583_s3 + $0x30] sm:$0xff]  ;;  %v153_v36 = vld [vmem:[%s583_s3 + $0x38] sm:$0xff]  ;;  %v154_v38 = vld [vmem:[%s583_s3 + $0x40] sm:$0xff] }
   0xa   :  { %378 = vmatprep.subr.bf16.mxu0 %v377_v8  ;;  %v413_v37 = vpack.c.bf16 %v153_v36, %v152_v35  ;;  %v155_v39 = vld [vmem:[%s583_s3 + $0x48] sm:$0xff]  ;;  %v156_v41 = vld [vmem:[%s583_s3 + $0x50] sm:$0xff]  ;;  %v157_v42 = vld [vmem:[%s583_s3 + $0x58] sm:$0xff] }
   0xb   :  { %406 = vmatprep.subr.bf16.mxu1 %v405_v31  ;;  %v417_v40 = vpack.c.bf16 %v155_v39, %v154_v38  ;;  %v158_v43 = vld [vmem:[%s583_s3 + $0x60] sm:$0xff]  ;;  %v421_v44 = vpack.c.bf16 %v157_v42, %v156_v41  ;;  %v159_v45 = vld [vmem:[%s583_s3 + $0x68] sm:$0xff]  ;;  %v160_v47 = vld [vmem:[%s583_s3 + $0x70] sm:$0xff] }
   0xc   :  { %408 = vmatpush3.bf16.msra.mxu1 %v405_v31  ;;  %v425_v46 = vpack.c.bf16 %v159_v45, %v158_v43  ;;  %v161_v48 = vld [vmem:[%s583_s3 + $0x78] sm:$0xff]  ;;  %v261_v50 = vld [vmem:[%s584_s2] ss:$0 sm:$0xff] }
   0xd   :  { %380 = vmatpush3.bf16.msra.mxu0 %v377_v8  ;;  %410 = vmatprep.subr.bf16.mxu1 %v409_v34  ;;  %v429_v49 = vpack.c.bf16 %v161_v48, %v160_v47  ;;  %v262_v9 = vld [vmem:[%s585_s4] ss:$0 sm:$0xff] }
   0xe   :  { %382 = vmatprep.subr.bf16.mxu0 %v381_v15 }
  0x10   :  { %412 = vmatpush3.bf16.msra.mxu1 %v409_v34 }
  0x11   :  { %384 = vmatpush3.bf16.msra.mxu0 %v381_v15  ;;  %414 = vmatprep.subr.bf16.mxu1 %v413_v37 }
  0x12   :  { %386 = vmatprep.subr.bf16.mxu0 %v385_v18 }
  0x14   :  { %416 = vmatpush3.bf16.msra.mxu1 %v413_v37 }
  0x15   :  { %388 = vmatpush3.bf16.msra.mxu0 %v385_v18  ;;  %418 = vmatprep.subr.bf16.mxu1 %v417_v40 }
  0x16   :  { %390 = vmatprep.subr.bf16.mxu0 %v389_v21 }
  0x18   :  { %420 = vmatpush3.bf16.msra.mxu1 %v417_v40 }
  0x19   :  { %392 = vmatpush3.bf16.msra.mxu0 %v389_v21  ;;  %422 = vmatprep.subr.bf16.mxu1 %v421_v44 }
  0x1a   :  { %394 = vmatprep.subr.bf16.mxu0 %v393_v24 }
  0x1c   :  { %424 = vmatpush3.bf16.msra.mxu1 %v421_v44 }
  0x1d   :  { %396 = vmatpush3.bf16.msra.mxu0 %v393_v24  ;;  %426 = vmatprep.subr.bf16.mxu1 %v425_v46 }
  0x1e   :  { %398 = vmatprep.subr.bf16.mxu0 %v397_v27 }
  0x20   :  { %428 = vmatpush3.bf16.msra.mxu1 %v425_v46 }
  0x21   :  { %400 = vmatpush3.bf16.msra.mxu0 %v397_v27  ;;  %430 = vmatprep.subr.bf16.mxu1 %v429_v49 }
  0x24   :  { %332 = vmatmul.mubr.f32.vlgmr.msra.gmra.mrb[0].mxu0 %v27_v28  ;;  %432 = vmatpush3.bf16.msra.mxu1 %v429_v49 }
  0xf7   :  { %v333_v51 = vpop.f32.mrb[0].mxu0 }
  0xf8   :  { %v123_v52 = vadd.f32 %v333_v51, %v261_v50  ;;  %v117_v53 = vpop.f32.mrb[1].mxu0 }
  0xf9   :  { %v118_v54 = vadd.f32 %v261_v50, %v117_v53 }
  0xfa   :  { %v131_v55 = vmul.f32 %v123_v52, %v123_v52  ;;  %v129_v59 = vmul.f32 0.7978846, %v123_v52  ;;  %v127_v6 = vmul.f32 0.5, %v123_v52 }
  0xfb   :  { %v130_v56 = vmul.f32 %v118_v54, %v118_v54  ;;  %v128_v61 = vmul.f32 0.7978846, %v118_v54  ;;  %v126_v4 = vmul.f32 0.5, %v118_v54 }
  0xfc   :  { %v133_v57 = vmul.f32 0.044715, %v131_v55 }
  0xfd   :  { %v132_v58 = vmul.f32 0.044715, %v130_v56 }
  0xfe   :  { %v135_v60 = vadd.f32 1.0, %v133_v57 }
  0xff   :  { %v134_v62 = vadd.f32 1.0, %v132_v58 }
 0x100   :  { %v137_v63 = vmul.f32 %v135_v60, %v129_v59 }
 0x101   :  { %v136_v0 = vmul.f32 %v134_v62, %v128_v61 }
 0x102   :  { %433 = vtanh.f32 %v137_v63 }
 0x103   :  { %435 = vtanh.f32 %v136_v0 }
 0x10c   :  { %v434_v1 = vpop.eup %433 }
 0x10d   :  { %v436_v2 = vpop.eup %435  ;;  %v141_v3 = vadd.f32 1.0, %v434_v1 }
 0x10e   :  { %v140_v5 = vadd.f32 1.0, %v436_v2 }
 0x10f   :  { %v143_v8 = vmul.f32 %v141_v3, %v127_v6 }
 0x110   :  { %v142_v7 = vmul.f32 %v140_v5, %v126_v4 }
 0x112   :  { %366 = vmatprep.mubr.f32.mxu1 %v142_v7 }
 0x113   :  { %367 = vmatmul.mubr.f32.vlgmr.msra.gmra.mrb[0].mxu1 %v143_v8 }
 0x1e6   :  { %v368_v10 = vpop.f32.mrb[0].mxu1 }
 0x1e7   :  { %v254_v11 = vadd.f32 %v368_v10, %v262_v9  ;;  %v228_v12 = vpop.f32.mrb[1].mxu1 }
 0x1e8   :  { %v253_v13 = vadd.f32 %v262_v9, %v228_v12 }
 0x1e9   :  { %256 = vst [vmem:[%s586_s5 + $0x8] sm:$0xff] %v254_v11 }
 0x1ea   :  { %255 = vst [vmem:[%s586_s5] sm:$0xff] %v253_v13 }

</bundles_post_ra>
